<compile_context>
chip_gen: v6e
topology: v6e:2x2x1
jax: 0.10.0
libtpu: 0.0.40
codegen_flags: <defaults>
</compile_context>

<pallas_src>
import functools

import jax
import jax.numpy as jnp
from jax import lax
from jax.experimental import pallas as pl
from jax.experimental.pallas import tpu as pltpu


def _linear_layer_kernel(x_q_ref, x_kv_ref, wq_ref, wk_ref, wv_ref, o_ref,
                         q_scr, m_scr, l_scr, acc_scr,
                         *, inv_n, n_valid, tile_k, need_mask):
    """One (query-tile, key-tile) grid step of sigmoid-attention with online softmax."""
    ki = pl.program_id(1)
    # Contract axis 1 of both operands (x:[T,in] vs W:[out,in], q:[TQ,out] vs k:[TK,out]).
    contract_last = (((1,), (1,)), ((), ()))

    @pl.when(ki == 0)
    def _init():
        # q projection once per query tile; fold the 1/N score scaling into q here
        # (O(TQ*out) VPU work instead of O(TQ*TK) on the scores tile).
        q = jax.nn.sigmoid(
            lax.dot_general(x_q_ref[...], wq_ref[...], contract_last,
                            preferred_element_type=jnp.float32))
        q_scr[...] = q * jnp.float32(inv_n)
        m_scr[...] = jnp.full(m_scr.shape, -1e30, dtype=jnp.float32)
        l_scr[...] = jnp.zeros(l_scr.shape, dtype=jnp.float32)
        acc_scr[...] = jnp.zeros(acc_scr.shape, dtype=jnp.float32)

    # k / v projections for this key tile; the MXU consumes the [out, in] weights
    # directly via dot_general -> no transpose on the critical path.
    x_kv = x_kv_ref[...]
    k = jax.nn.sigmoid(lax.dot_general(x_kv, wk_ref[...], contract_last,
                                       preferred_element_type=jnp.float32))
    v = jax.nn.sigmoid(lax.dot_general(x_kv, wv_ref[...], contract_last,
                                       preferred_element_type=jnp.float32))

    # scores tile = (q / N) @ k.T, again without an explicit transpose.
    s = lax.dot_general(q_scr[...], k, contract_last,
                        preferred_element_type=jnp.float32)          # [TQ, TK]

    if need_mask:
        # Mask out zero-padded key rows so they never enter the softmax denominator.
        key_ids = ki * tile_k + lax.broadcasted_iota(jnp.int32, s.shape, 1)
        s = jnp.where(key_ids < n_valid, s, jnp.float32(-1e30))

    # Online (flash-style) softmax accumulation across key tiles.
    m_prev = m_scr[...]
    m_new = jnp.maximum(m_prev, jnp.max(s, axis=-1, keepdims=True))
    alpha = jnp.exp(m_prev - m_new)
    p = jnp.exp(s - m_new)
    l_scr[...] = alpha * l_scr[...] + jnp.sum(p, axis=-1, keepdims=True)
    acc_scr[...] = alpha * acc_scr[...] + jnp.dot(p, v, preferred_element_type=jnp.float32)
    m_scr[...] = m_new

    @pl.when(ki == pl.num_programs(1) - 1)
    def _finalize():
        # Exact reciprocal keeps us within 1e-5 of the reference softmax;
        # pl.reciprocal(..., approx=True) would push the divide onto the idle EUP slot.
        attn = acc_scr[...] * pl.reciprocal(l_scr[...])
        o_ref[...] = jax.nn.sigmoid(attn).astype(o_ref.dtype)


def linear_layer(x, wq, wk, wv, *, max_tile=256):
    """x: [N, in_x]; wq/wk/wv: PyTorch-convention [out_x, in_x] weights (no transpose needed)."""
    n, in_x = x.shape
    out_x = wq.shape[0]
    assert wq.shape == (out_x, in_x) and wk.shape == (out_x, in_x) and wv.shape == (out_x, in_x)

    # Row tiling: full-dim single block when small (no padding / masking needed),
    # otherwise 8-aligned tiles with zero-padded rows + in-kernel key masking.
    if n <= max_tile:
        tile = n
        n_pad = n
    else:
        tile = max_tile
        n_pad = pl.cdiv(n, tile) * tile
    need_mask = n_pad != n

    # Lane-dense output: pad the V/output feature axis to a multiple of 128 so the
    # final stores are unmasked. Padded columns come from zero weight rows
    # (-> sigmoid(0)=0.5) and are sliced off below; scores are untouched because
    # wq / wk are NOT padded.
    out_pad = -(-out_x // 128) * 128

    x_p = x if n_pad == n else jnp.pad(x, ((0, n_pad - n), (0, 0)))
    wv_p = wv if out_pad == out_x else jnp.pad(wv, ((0, out_pad - out_x), (0, 0)))

    n_q = n_pad // tile
    n_k = n_pad // tile

    kernel = functools.partial(
        _linear_layer_kernel,
        inv_n=1.0 / float(n),     # PyTorch divides scores by k.shape[0] == N
        n_valid=n,
        tile_k=tile,
        need_mask=need_mask,
    )

    grid_spec = pltpu.PrefetchScalarGridSpec(
        num_scalar_prefetch=0,
        grid=(n_q, n_k),
        in_specs=[
            pl.BlockSpec((tile, in_x), lambda qi, ki: (qi, 0)),      # x rows -> q
            pl.BlockSpec((tile, in_x), lambda qi, ki: (ki, 0)),      # x rows -> k / v
            pl.BlockSpec((out_x, in_x), lambda qi, ki: (0, 0)),      # Wq (VMEM-resident)
            pl.BlockSpec((out_x, in_x), lambda qi, ki: (0, 0)),      # Wk (VMEM-resident)
            pl.BlockSpec((out_pad, in_x), lambda qi, ki: (0, 0)),    # Wv (lane-padded, resident)
        ],
        out_specs=pl.BlockSpec((tile, out_pad), lambda qi, ki: (qi, 0)),
        scratch_shapes=[
            pltpu.VMEM((tile, out_x), jnp.float32),    # q tile (pre-scaled by 1/N)
            pltpu.VMEM((tile, 1), jnp.float32),        # running max  m
            pltpu.VMEM((tile, 1), jnp.float32),        # running sum  l
            pltpu.VMEM((tile, out_pad), jnp.float32),  # running numerator acc
        ],
    )

    out = pl.pallas_call(
        kernel,
        out_shape=jax.ShapeDtypeStruct((n_pad, out_pad), x.dtype),
        grid_spec=grid_spec,
        compiler_params=pltpu.CompilerParams(
            dimension_semantics=("parallel", "arbitrary"),
        ),
    )(x_p, x_p, wq, wk, wv_p)

    return out[:n, :out_x]


def _reference(x, wq, wk, wv):
    q = jax.nn.sigmoid(x @ wq.T)
    k = jax.nn.sigmoid(x @ wk.T)
    v = jax.nn.sigmoid(x @ wv.T)
    s = jax.nn.softmax((q @ k.T) / k.shape[0], axis=1)
    return jax.nn.sigmoid(s @ v)


if __name__ == "__main__":
    key = jax.random.PRNGKey(0)
    kx, kq, kk, kv, kx2 = jax.random.split(key, 5)

    # Small shapes consistent with LinearLayer(in_x=32, out_x=16) over 8 tokens.
    N, IN_X, OUT_X = 8, 32, 16
    x = jax.random.normal(kx, (N, IN_X), dtype=jnp.float32)
    bound = 1.0 / (IN_X ** 0.5)
    wq = jax.random.uniform(kq, (OUT_X, IN_X), minval=-bound, maxval=bound, dtype=jnp.float32)
    wk = jax.random.uniform(kk, (OUT_X, IN_X), minval=-bound, maxval=bound, dtype=jnp.float32)
    wv = jax.random.uniform(kv, (OUT_X, IN_X), minval=-bound, maxval=bound, dtype=jnp.float32)

    out = jax.block_until_ready(linear_layer(x, wq, wk, wv))
    ref = _reference(x, wq, wk, wv)
    assert out.shape == (N, OUT_X)
    assert jnp.allclose(out, ref, atol=1e-5, rtol=1e-5)

    # Second check: exercise the multi-tile grid, online softmax and key masking path.
    N2 = 40
    x2 = jax.random.normal(kx2, (N2, IN_X), dtype=jnp.float32)
    out2 = jax.block_until_ready(linear_layer(x2, wq, wk, wv, max_tile=16))
    ref2 = _reference(x2, wq, wk, wv)
    assert out2.shape == (N2, OUT_X)
    assert jnp.allclose(out2, ref2, atol=1e-5, rtol=1e-5)

    print("KERNEL_OK")
</pallas_src>

<mosaic_0001>
module attributes {stable_mosaic.version = 11 : i64} {
  func.func @_linear_layer_kernel(%arg0: i32, %arg1: i32, %arg2: memref<8x32xf32, #tpu.memory_space<vmem>>, %arg3: memref<8x32xf32, #tpu.memory_space<vmem>>, %arg4: memref<16x32xf32, #tpu.memory_space<vmem>>, %arg5: memref<16x32xf32, #tpu.memory_space<vmem>>, %arg6: memref<128x32xf32, #tpu.memory_space<vmem>>, %arg7: memref<8x128xf32, #tpu.memory_space<vmem>>, %arg8: memref<8x16xf32, #tpu.memory_space<vmem>>, %arg9: memref<8x1xf32, #tpu.memory_space<vmem>>, %arg10: memref<8x1xf32, #tpu.memory_space<vmem>>, %arg11: memref<8x128xf32, #tpu.memory_space<vmem>>) attributes {dimension_semantics = [#tpu.dimension_semantics<parallel>, #tpu.dimension_semantics<arbitrary>], iteration_bounds = array<i64: 1, 1>, scalar_prefetch = 0 : i64, scratch_operands = 4 : i64, tpu.core_type = #tpu.core_type<tc>, window_params = [{transform_indices = @transform_0, window_bounds = array<i64: 8, 32>}, {transform_indices = @transform_1, window_bounds = array<i64: 8, 32>}, {pipeline_mode = #tpu.pipeline_mode<synchronous>, transform_indices = @transform_2, window_bounds = array<i64: 16, 32>}, {pipeline_mode = #tpu.pipeline_mode<synchronous>, transform_indices = @transform_3, window_bounds = array<i64: 16, 32>}, {pipeline_mode = #tpu.pipeline_mode<synchronous>, transform_indices = @transform_4, window_bounds = array<i64: 128, 32>}, {transform_indices = @transform_5, window_bounds = array<i64: 8, 128>}]} {
    %c0_i32 = arith.constant 0 : i32
    %0 = arith.cmpi eq, %arg1, %c0_i32 : i32
    %1 = arith.extui %0 : i1 to i32
    %c0_i32_0 = arith.constant 0 : i32
    %2 = arith.cmpi ne, %1, %c0_i32_0 : i32
    scf.if %2 {
      %c0_29 = arith.constant 0 : index
      %c0_30 = arith.constant 0 : index
      %45 = vector.load %arg2[%c0_29, %c0_30] : memref<8x32xf32, #tpu.memory_space<vmem>>, vector<8x32xf32>
      %c0_31 = arith.constant 0 : index
      %c0_32 = arith.constant 0 : index
      %46 = vector.load %arg4[%c0_31, %c0_32] : memref<16x32xf32, #tpu.memory_space<vmem>>, vector<16x32xf32>
      %cst_33 = arith.constant dense<0.000000e+00> : vector<8x16xf32>
      %47 = tpu.matmul %45, %46, %cst_33 {dimension_numbers = #tpu.dot_dimension_numbers<[1], [1], [0], [0], [0, 0, 1, 0], [], []>} : vector<8x32xf32>, vector<16x32xf32>, vector<8x16xf32> -> vector<8x16xf32>
      %48 = arith.negf %47 : vector<8x16xf32>
      %49 = math.exp %48 : vector<8x16xf32>
      %cst_34 = arith.constant 1.000000e+00 : f32
      %50 = vector.broadcast %cst_34 : f32 to vector<8x16xf32>
      %51 = arith.addf %50, %49 : vector<8x16xf32>
      %52 = arith.divf %50, %51 : vector<8x16xf32>
      %cst_35 = arith.constant 1.250000e-01 : f32
      %53 = vector.broadcast %cst_35 : f32 to vector<8x16xf32>
      %54 = arith.mulf %52, %53 : vector<8x16xf32>
      %c0_36 = arith.constant 0 : index
      %c0_37 = arith.constant 0 : index
      %55 = vector.load %arg8[%c0_36, %c0_37] : memref<8x16xf32, #tpu.memory_space<vmem>>, vector<8x16xf32>
      tpu.vector_store %arg8[%c0_36, %c0_37], %54 {strides = array<i32>} : memref<8x16xf32, #tpu.memory_space<vmem>>, vector<8x16xf32>,
      %cst_38 = arith.constant -1.000000e+30 : f32
      %56 = vector.broadcast %cst_38 : f32 to vector<8x1xf32>
      %c0_39 = arith.constant 0 : index
      %c0_40 = arith.constant 0 : index
      %57 = vector.load %arg9[%c0_39, %c0_40] : memref<8x1xf32, #tpu.memory_space<vmem>>, vector<8x1xf32>
      tpu.vector_store %arg9[%c0_39, %c0_40], %56 {strides = array<i32>} : memref<8x1xf32, #tpu.memory_space<vmem>>, vector<8x1xf32>,
      %cst_41 = arith.constant 0.000000e+00 : f32
      %58 = vector.broadcast %cst_41 : f32 to vector<8x1xf32>
      %c0_42 = arith.constant 0 : index
      %c0_43 = arith.constant 0 : index
      %59 = vector.load %arg10[%c0_42, %c0_43] : memref<8x1xf32, #tpu.memory_space<vmem>>, vector<8x1xf32>
      tpu.vector_store %arg10[%c0_42, %c0_43], %58 {strides = array<i32>} : memref<8x1xf32, #tpu.memory_space<vmem>>, vector<8x1xf32>,
      %cst_44 = arith.constant 0.000000e+00 : f32
      %60 = vector.broadcast %cst_44 : f32 to vector<8x128xf32>
      %c0_45 = arith.constant 0 : index
      %c0_46 = arith.constant 0 : index
      %61 = vector.load %arg11[%c0_45, %c0_46] : memref<8x128xf32, #tpu.memory_space<vmem>>, vector<8x128xf32>
      tpu.vector_store %arg11[%c0_45, %c0_46], %60 {strides = array<i32>} : memref<8x128xf32, #tpu.memory_space<vmem>>, vector<8x128xf32>,
    } else {
    }
    %c0 = arith.constant 0 : index
    %c0_1 = arith.constant 0 : index
    %3 = vector.load %arg3[%c0, %c0_1] : memref<8x32xf32, #tpu.memory_space<vmem>>, vector<8x32xf32>
    %c0_2 = arith.constant 0 : index
    %c0_3 = arith.constant 0 : index
    %4 = vector.load %arg5[%c0_2, %c0_3] : memref<16x32xf32, #tpu.memory_space<vmem>>, vector<16x32xf32>
    %cst = arith.constant dense<0.000000e+00> : vector<8x16xf32>
    %5 = tpu.matmul %3, %4, %cst {dimension_numbers = #tpu.dot_dimension_numbers<[1], [1], [0], [0], [0, 0, 1, 0], [], []>} : vector<8x32xf32>, vector<16x32xf32>, vector<8x16xf32> -> vector<8x16xf32>
    %6 = arith.negf %5 : vector<8x16xf32>
    %7 = math.exp %6 : vector<8x16xf32>
    %cst_4 = arith.constant 1.000000e+00 : f32
    %8 = vector.broadcast %cst_4 : f32 to vector<8x16xf32>
    %9 = arith.addf %8, %7 : vector<8x16xf32>
    %10 = arith.divf %8, %9 : vector<8x16xf32>
    %c0_5 = arith.constant 0 : index
    %c0_6 = arith.constant 0 : index
    %11 = vector.load %arg6[%c0_5, %c0_6] : memref<128x32xf32, #tpu.memory_space<vmem>>, vector<128x32xf32>
    %cst_7 = arith.constant dense<0.000000e+00> : vector<8x128xf32>
    %12 = tpu.matmul %3, %11, %cst_7 {dimension_numbers = #tpu.dot_dimension_numbers<[1], [1], [0], [0], [0, 0, 1, 0], [], []>} : vector<8x32xf32>, vector<128x32xf32>, vector<8x128xf32> -> vector<8x128xf32>
    %13 = arith.negf %12 : vector<8x128xf32>
    %14 = math.exp %13 : vector<8x128xf32>
    %cst_8 = arith.constant 1.000000e+00 : f32
    %15 = vector.broadcast %cst_8 : f32 to vector<8x128xf32>
    %16 = arith.addf %15, %14 : vector<8x128xf32>
    %17 = arith.divf %15, %16 : vector<8x128xf32>
    %c0_9 = arith.constant 0 : index
    %c0_10 = arith.constant 0 : index
    %18 = vector.load %arg8[%c0_9, %c0_10] : memref<8x16xf32, #tpu.memory_space<vmem>>, vector<8x16xf32>
    %cst_11 = arith.constant dense<0.000000e+00> : vector<8x8xf32>
    %19 = tpu.matmul %18, %10, %cst_11 {dimension_numbers = #tpu.dot_dimension_numbers<[1], [1], [0], [0], [0, 0, 1, 0], [], []>} : vector<8x16xf32>, vector<8x16xf32>, vector<8x8xf32> -> vector<8x8xf32>
    %c0_12 = arith.constant 0 : index
    %c0_13 = arith.constant 0 : index
    %20 = vector.load %arg9[%c0_12, %c0_13] : memref<8x1xf32, #tpu.memory_space<vmem>>, vector<8x1xf32>
    %cst_14 = arith.constant dense<0xFF800000> : vector<8xf32>
    %21 = vector.multi_reduction <maximumf>, %19, %cst_14 [1] : vector<8x8xf32> to vector<8xf32>
    %22 = vector.shape_cast %21 : vector<8xf32> to vector<8x1xf32>
    %23 = arith.maximumf %20, %22 : vector<8x1xf32>
    %24 = arith.subf %20, %23 : vector<8x1xf32>
    %25 = math.exp %24 : vector<8x1xf32>
    %26 = vector.broadcast %23 : vector<8x1xf32> to vector<8x8xf32>
    %27 = arith.subf %19, %26 : vector<8x8xf32>
    %28 = math.exp %27 : vector<8x8xf32>
    %c0_15 = arith.constant 0 : index
    %c0_16 = arith.constant 0 : index
    %29 = vector.load %arg10[%c0_15, %c0_16] : memref<8x1xf32, #tpu.memory_space<vmem>>, vector<8x1xf32>
    %30 = arith.mulf %25, %29 : vector<8x1xf32>
    %cst_17 = arith.constant dense<0.000000e+00> : vector<8xf32>
    %31 = vector.multi_reduction <add>, %28, %cst_17 [1] : vector<8x8xf32> to vector<8xf32>
    %32 = vector.shape_cast %31 : vector<8xf32> to vector<8x1xf32>
    %33 = arith.addf %30, %32 : vector<8x1xf32>
    %c0_18 = arith.constant 0 : index
    %c0_19 = arith.constant 0 : index
    %34 = vector.load %arg10[%c0_18, %c0_19] : memref<8x1xf32, #tpu.memory_space<vmem>>, vector<8x1xf32>
    tpu.vector_store %arg10[%c0_18, %c0_19], %33 {strides = array<i32>} : memref<8x1xf32, #tpu.memory_space<vmem>>, vector<8x1xf32>,
    %c0_20 = arith.constant 0 : index
    %c0_21 = arith.constant 0 : index
    %35 = vector.load %arg11[%c0_20, %c0_21] : memref<8x128xf32, #tpu.memory_space<vmem>>, vector<8x128xf32>
    %36 = vector.broadcast %25 : vector<8x1xf32> to vector<8x128xf32>
    %37 = arith.mulf %36, %35 : vector<8x128xf32>
    %cst_22 = arith.constant dense<0.000000e+00> : vector<8x128xf32>
    %38 = tpu.matmul %28, %17, %cst_22 {dimension_numbers = #tpu.dot_dimension_numbers<[1], [0], [0], [1], [0, 0, 1, 1], [], []>} : vector<8x8xf32>, vector<8x128xf32>, vector<8x128xf32> -> vector<8x128xf32>
    %39 = arith.addf %37, %38 : vector<8x128xf32>
    %c0_23 = arith.constant 0 : index
    %c0_24 = arith.constant 0 : index
    %40 = vector.load %arg11[%c0_23, %c0_24] : memref<8x128xf32, #tpu.memory_space<vmem>>, vector<8x128xf32>
    tpu.vector_store %arg11[%c0_23, %c0_24], %39 {strides = array<i32>} : memref<8x128xf32, #tpu.memory_space<vmem>>, vector<8x128xf32>,
    %c0_25 = arith.constant 0 : index
    %c0_26 = arith.constant 0 : index
    %41 = vector.load %arg9[%c0_25, %c0_26] : memref<8x1xf32, #tpu.memory_space<vmem>>, vector<8x1xf32>
    tpu.vector_store %arg9[%c0_25, %c0_26], %23 {strides = array<i32>} : memref<8x1xf32, #tpu.memory_space<vmem>>, vector<8x1xf32>,
    %c0_i32_27 = arith.constant 0 : i32
    %42 = arith.cmpi eq, %arg1, %c0_i32_27 : i32
    %43 = arith.extui %42 : i1 to i32
    %c0_i32_28 = arith.constant 0 : i32
    %44 = arith.cmpi ne, %43, %c0_i32_28 : i32
    scf.if %44 {
      %c0_29 = arith.constant 0 : index
      %c0_30 = arith.constant 0 : index
      %45 = vector.load %arg11[%c0_29, %c0_30] : memref<8x128xf32, #tpu.memory_space<vmem>>, vector<8x128xf32>
      %c0_31 = arith.constant 0 : index
      %c0_32 = arith.constant 0 : index
      %46 = vector.load %arg10[%c0_31, %c0_32] : memref<8x1xf32, #tpu.memory_space<vmem>>, vector<8x1xf32>
      %47 = tpu.reciprocal %46 : vector<8x1xf32> -> vector<8x1xf32>
      %48 = vector.broadcast %47 : vector<8x1xf32> to vector<8x128xf32>
      %49 = arith.mulf %45, %48 : vector<8x128xf32>
      %50 = arith.negf %49 : vector<8x128xf32>
      %51 = math.exp %50 : vector<8x128xf32>
      %cst_33 = arith.constant 1.000000e+00 : f32
      %52 = vector.broadcast %cst_33 : f32 to vector<8x128xf32>
      %53 = arith.addf %52, %51 : vector<8x128xf32>
      %54 = arith.divf %52, %53 : vector<8x128xf32>
      %c0_34 = arith.constant 0 : index
      %c0_35 = arith.constant 0 : index
      %55 = vector.load %arg7[%c0_34, %c0_35] : memref<8x128xf32, #tpu.memory_space<vmem>>, vector<8x128xf32>
      tpu.vector_store %arg7[%c0_34, %c0_35], %54 {strides = array<i32>} : memref<8x128xf32, #tpu.memory_space<vmem>>, vector<8x128xf32>,
    } else {
    }
    return
  }
  func.func @transform_0(%arg0: i32, %arg1: i32) -> (i32, i32) {
    %c0_i32 = arith.constant 0 : i32
    %c0_i32_0 = arith.constant 0 : i32
    return %arg0, %c0_i32 : i32, i32
  }
  func.func @transform_1(%arg0: i32, %arg1: i32) -> (i32, i32) {
    %c0_i32 = arith.constant 0 : i32
    %c0_i32_0 = arith.constant 0 : i32
    return %arg1, %c0_i32 : i32, i32
  }
  func.func @transform_2(%arg0: i32, %arg1: i32) -> (i32, i32) {
    %c0_i32 = arith.constant 0 : i32
    %c0_i32_0 = arith.constant 0 : i32
    %c0_i32_1 = arith.constant 0 : i32
    return %c0_i32, %c0_i32_0 : i32, i32
  }
  func.func @transform_3(%arg0: i32, %arg1: i32) -> (i32, i32) {
    %c0_i32 = arith.constant 0 : i32
    %c0_i32_0 = arith.constant 0 : i32
    %c0_i32_1 = arith.constant 0 : i32
    return %c0_i32, %c0_i32_0 : i32, i32
  }
  func.func @transform_4(%arg0: i32, %arg1: i32) -> (i32, i32) {
    %c0_i32 = arith.constant 0 : i32
    %c0_i32_0 = arith.constant 0 : i32
    %c0_i32_1 = arith.constant 0 : i32
    return %c0_i32, %c0_i32_0 : i32, i32
  }
  func.func @transform_5(%arg0: i32, %arg1: i32) -> (i32, i32) {
    %c0_i32 = arith.constant 0 : i32
    %c0_i32_0 = arith.constant 0 : i32
    return %arg0, %c0_i32 : i32, i32
  }
}

</mosaic_0001>

<bundles_post_ra>
// kernel: tpu_custom_call.1
= control target key start
LH: loop header
LB: loop body
LE: loop exit
PB: predicated region body
PF: predicated region fallthrough
CT: control target
= control target key end

     0   :  { %vm28_vm0 = vcmask 261120   ;;  %v736_v1 = vmov 0.0   ;;  %vm737_vm1 = vmmov 0   ;;  %s907_s0 = inlined_call_operand.vmem [shape: f32[8,32], index: 0, kind: input, shape index: {}]   ;;  %s908_s1 = inlined_call_operand.vmem [shape: f32[8,32], index: 1, kind: input, shape index: {}]   ;;  %s909_s2 = inlined_call_operand.vmem [shape: f32[16,32], index: 2, kind: input, shape index: {}]   ;;  %s910_s3 = inlined_call_operand.vmem [shape: f32[16,32], index: 3, kind: input, shape index: {}]   ;;  %s911_s4 = inlined_call_operand.vmem [shape: f32[128,32], index: 4, kind: input, shape index: {}]   ;;  %s912_s5 = inlined_call_operand.hbm [shape: f32[8,128], index: 5, kind: output, shape index: {}]  }
   0x1   :  { %v27_v0 = vld [vmem:[%s909_s2 + $0x8] sm:$0xff]  ;;  %626 = vmatprep.subr.mxu1 %v736_v1  ;;  %630 = vmatprep.mubr.msk.f32.mxu1 %vm737_vm1, %v736_v1 }
   0x2   :  { %627 = vmatpush3.xpose.msk.msra.mxu1 %vm28_vm0, %v27_v0  ;;  %640 = vmatprep.subr.mxu0 %v736_v1 }
   0x3   :  { %10 = vsyncpa [#allocation7], 0  ;;  %628 = vmatprep.subr.mxu1 %v736_v1  ;;  %v26_v2 = vld [vmem:[%s909_s2] sm:$0xff]  ;;  %672 = vmatprep.mubr.msk.f32.mxu0 %vm737_vm1, %v736_v1  ;;  %v123_v4 = vld [vmem:[%s910_s3 + $0x8] sm:$0xff]  ;;  %vm115_vm2 = vcmask 130048   ;;  %vm117_vm3 = vcmask 7168  }
   0x4   :  { %v25_v3 = vld [vmem:[%s907_s0] sm:$0xff]  ;;  %v225_v7 = vld [vmem:[%s911_s4 + $0x78] sm:$0xff]  ;;  %v224_v8 = vld [vmem:[%s911_s4 + $0x70] sm:$0xff]  ;;  %v738_v24 = vmov -1e+30   ;;  %119 = vst.msk [vmem:[#allocation4] sm:$0xff] %vm117_vm3, %v736_v1 }
   0x5   :  { %v122_v5 = vld [vmem:[%s910_s3] sm:$0xff]  ;;  %641 = vmatpush3.xpose.msk.msra.mxu0 %vm28_vm0, %v225_v7  ;;  %v223_v23 = vld [vmem:[%s911_s4 + $0x68] sm:$0xff]  ;;  %118 = vst.msk [vmem:[#allocation3] sm:$0xff] %vm117_vm3, %v738_v24  ;;  %v221_v26 = vld [vmem:[%s911_s4 + $0x58] sm:$0xff]  ;;  %vm429_vm4 = vcmask 64512   ;;  %v739_v41 = vmov 0  }
   0x6   :  { %629 = vmatpush3.xpose.msk.msra.mxu1 %vm28_vm0, %v26_v2  ;;  %v805_v6 = vld [vmem:[%s908_s1] sm:$0xff]  ;;  %642 = vmatprep.subr.mxu0 %v736_v1  ;;  %v220_v27 = vld [vmem:[%s911_s4 + $0x50] sm:$0xff]  ;;  %v219_v28 = vld [vmem:[%s911_s4 + $0x48] sm:$0xff] }
   0x7   :  { %633 = vmatprep.subr.mxu1 %v736_v1  ;;  %v222_v25 = vld [vmem:[%s911_s4 + $0x60] sm:$0xff]  ;;  %v217_v30 = vld [vmem:[%s911_s4 + $0x38] sm:$0xff]  ;;  %v216_v31 = vld [vmem:[%s911_s4 + $0x30] sm:$0xff]  ;;  %690 = vset.pattern.permute.xlu0 %v739_v41 }
   0x8   :  { %v218_v29 = vld [vmem:[%s911_s4 + $0x40] sm:$0xff]  ;;  %v215_v32 = vld [vmem:[%s911_s4 + $0x28] sm:$0xff]  ;;  %v213_v34 = vld [vmem:[%s911_s4 + $0x18] sm:$0xff]  ;;  %691 = vset.pattern.permute.xlu1 %v739_v41 }
   0x9   :  { %631 = vmatmul.mubr.msk.f32.vlgmr.msra.gmra.mxu1 %vm28_vm0, %v25_v3  ;;  %643 = vmatpush3.xpose.msk.msra.mxu0 %vm28_vm0, %v224_v8  ;;  %v214_v33 = vld [vmem:[%s911_s4 + $0x20] sm:$0xff]  ;;  %v212_v35 = vld [vmem:[%s911_s4 + $0x10] sm:$0xff]  ;;  %v211_v36 = vld [vmem:[%s911_s4 + $0x8] sm:$0xff] }
   0xa   :  { %634 = vmatpush3.xpose.msk.msra.mxu1 %vm28_vm0, %v123_v4  ;;  %637 = vmatprep.mubr.msk.f32.mxu1 %vm737_vm1, %v736_v1  ;;  %v210_v37 = vld [vmem:[%s911_s4] sm:$0xff]  ;;  %s740_s4 = smov [#allocation6]  }
   0xb   :  { %635 = vmatprep.subr.mxu1 %v736_v1  ;;  %644 = vmatprep.subr.mxu0 %v736_v1  ;;  %v445_v59 = vld [vmem:[#allocation4] sm:$0xff]  ;;  %s561_s30 = sshll.u32 %s740_s4, 4  ;;  %s562_s30 = int_to_ptr.vmem [resolvable:$true] %s561_s30 }
   0xc   :  { %v428_v45 = vld [vmem:[#allocation3] sm:$0xff]  ;;  %s714_s1 = scalar_lea.vmem %s562_s30, 128  ;;  %p719_p1 = scmp.lt.s32.totalorder %s562_s30, %s562_s30 }
   0xd   :  { %645 = vmatpush3.xpose.msk.msra.mxu0 %vm28_vm0, %v223_v23  ;;  %p715_p0 = scmp.ne.s32.totalorder %s562_s30, %s714_s1  ;;  %p720_p2 = scmp.lt.s32.totalorder %s714_s1, %s714_s1 }
   0xe   :  { %636 = vmatpush3.xpose.msk.msra.mxu1 %vm28_vm0, %v122_v5  ;;  %646 = vmatprep.subr.mxu0 %v736_v1 }
   0xf   :  { %675 = vmatprep.subr.mxu1 %v736_v1  ;;  %p721_p3 = por %p720_p2, %p719_p1 }
  0x11   :  { %638 = vmatmul.mubr.msk.f32.vlgmr.msra.gmra.mxu1 %vm28_vm0, %v805_v6  ;;  %647 = vmatpush3.xpose.msk.msra.mxu0 %vm28_vm0, %v222_v25  ;;  %p722_p4 = pnand %p721_p3, %p715_p0 }
  0x12   :  { %677 = vmatprep.mubr.msk.f32.mxu1 %vm737_vm1, %v736_v1  ;;  %648 = vmatprep.subr.mxu0 %v736_v1 }
  0x15   :  { %649 = vmatpush3.xpose.msk.msra.mxu0 %vm28_vm0, %v221_v26 }
  0x16   :  { %650 = vmatprep.subr.mxu0 %v736_v1 }
  0x19   :  { %651 = vmatpush3.xpose.msk.msra.mxu0 %vm28_vm0, %v220_v27 }
  0x1a   :  { %652 = vmatprep.subr.mxu0 %v736_v1 }
  0x1d   :  { %653 = vmatpush3.xpose.msk.msra.mxu0 %vm28_vm0, %v219_v28 }
  0x1e   :  { %654 = vmatprep.subr.mxu0 %v736_v1 }
  0x21   :  { %655 = vmatpush3.xpose.msk.msra.mxu0 %vm28_vm0, %v218_v29 }
  0x22   :  { %656 = vmatprep.subr.mxu0 %v736_v1 }
  0x25   :  { %657 = vmatpush3.xpose.msk.msra.mxu0 %vm28_vm0, %v217_v30 }
  0x26   :  { %658 = vmatprep.subr.mxu0 %v736_v1 }
  0x29   :  { %659 = vmatpush3.xpose.msk.msra.mxu0 %vm28_vm0, %v216_v31 }
  0x2a   :  { %660 = vmatprep.subr.mxu0 %v736_v1 }
  0x2d   :  { %661 = vmatpush3.xpose.msk.msra.mxu0 %vm28_vm0, %v215_v32 }
  0x2e   :  { %662 = vmatprep.subr.mxu0 %v736_v1 }
  0x31   :  { %663 = vmatpush3.xpose.msk.msra.mxu0 %vm28_vm0, %v214_v33 }
  0x32   :  { %664 = vmatprep.subr.mxu0 %v736_v1 }
  0x35   :  { %665 = vmatpush3.xpose.msk.msra.mxu0 %vm28_vm0, %v213_v34 }
  0x36   :  { %666 = vmatprep.subr.mxu0 %v736_v1 }
  0x39   :  { %667 = vmatpush3.xpose.msk.msra.mxu0 %vm28_vm0, %v212_v35 }
  0x3a   :  { %668 = vmatprep.subr.mxu0 %v736_v1 }
  0x3d   :  { %669 = vmatpush3.xpose.msk.msra.mxu0 %vm28_vm0, %v211_v36 }
  0x3e   :  { %670 = vmatprep.subr.mxu0 %v736_v1 }
  0x41   :  { %671 = vmatpush3.xpose.msk.msra.mxu0 %vm28_vm0, %v210_v37 }
  0x44   :  { %673 = vmatmul.mubr.msk.f32.vlgmr.msra.gmra.mxu0 %vm28_vm0, %v805_v6 }
  0xc9   :  { %v104_v9 = vpop.f32.mrf.mxu1 }
  0xca   :  { %v572_v10 = vmul.f32 -1.442695, %v104_v9 }
  0xcb   :  { %v632_v11 = vpop.f32.mrf.mxu1 }
  0xcc   :  { %692 = vpow2.f32 %v572_v10 }
  0xd1   :  { %v200_v12 = vpop.f32.mrf.mxu1 }
  0xd2   :  { %v576_v13 = vmul.f32 -1.442695, %v200_v12 }
  0xd3   :  { %v639_v14 = vpop.f32.mrf.mxu1 }
  0xd4   :  { %694 = vpow2.f32 %v576_v13 }
  0xd9   :  { %v693_v15 = vpop.eup %692 }
  0xda   :  { %v111_v16 = vadd.f32 1.0, %v693_v15 }
  0xdc   :  { %696 = vrcp.f32 %v111_v16 }
  0xe1   :  { %v695_v17 = vpop.eup %694 }
  0xe2   :  { %v207_v18 = vadd.f32 1.0, %v695_v17 }
  0xe4   :  { %698 = vrcp.f32 %v207_v18 }
  0xe9   :  { %v697_v19 = vpop.eup %696 }
  0xea   :  { %v114_v20 = vmul.f32 0.125, %v697_v19 }
  0xec   :  { %116 = vst.msk [vmem:[#allocation2] sm:$0xff] %vm115_vm2, %v114_v20 }
  0xf1   :  { %v699_v21 = vpop.eup %698 }
  0xf2   :  { %676 = vmatpush3.xpose.msk.msra.mxu1 %vm115_vm2, %v699_v21 }
  0xf3   :  { %v350_v22 = vld [vmem:[#allocation2] sm:$0xff]  ;;  %680 = vmatprep.subr.mxu1 %v736_v1 }
  0xf5   :  { %678 = vmatmul.mubr.msk.f32.vlgmr.msra.gmra.mxu1 %vm115_vm2, %v350_v22 }
  0xf6   :  { %682 = vmatprep.mubr.msk.f32.mxu1 %vm737_vm1, %v736_v1 }
 0x104   :  { %v340_v42 = vpop.f32.mrf.mxu0 }
 0x105   :  { %v594_v43 = vmul.f32 -1.442695, %v340_v42 }
 0x106   :  { %v674_v44 = vpop.f32.mrf.mxu0 }
 0x107   :  { %700 = vpow2.f32 %v594_v43 }
 0x114   :  { %v701_v46 = vpop.eup %700 }
 0x115   :  { %v347_v48 = vadd.f32 1.0, %v701_v46 }
 0x117   :  { %702 = vrcp.f32 %v347_v48 }
 0x124   :  { %v703_v51 = vpop.eup %702 }
 0x125   :  { %681 = vmatpush3.msra.mxu1 %v703_v51 }
 0x1b5   :  { %v424_v38 = vpop.f32.mrf.mxu1 }
 0x1b6   :  { %v430_v39 = vsel %vm429_vm4, %v424_v38, -inf }
 0x1b7   :  { %431 = vmax.xlane.f32.xlu0 %v430_v39  ;;  %v679_v40 = vpop.f32.mrf.mxu1 }
 0x240   :  { %v432_v47 = vpop.xlane.xlu0 %431 }
 0x241   :  { %v433_v49 = vmax.f32 %v428_v45, %v432_v47 }
 0x243   :  { %v434_v50 = vsub.f32 %v428_v45, %v433_v49  ;;  %535 = vst.msk [vmem:[#allocation3] sm:$0xff] %vm117_vm3, %v433_v49  ;;  %439 = vperm.xlu0 %690, %v433_v49  }
 0x245   :  { %v435_v56 = vmul.f32 1.442695, %v434_v50 }
 0x2be   :  { %v440_v52 = vpop.permute.xlu0 %439 }
 0x2bf   :  { %v442_v53 = vsub.f32 %v424_v38, %v440_v52 }
 0x2c1   :  { %v443_v54 = vmul.f32 1.442695, %v442_v53 }
 0x2c3   :  { %704 = vpow2.f32 %v443_v54 }
 0x2c4   :  { %706 = vpow2.f32 %v435_v56 }
 0x2d0   :  { %v705_v55 = vpop.eup %704 }
 0x2d1   :  { %683 = vmatmul.mubr.msk.f32.vlgmr.msra.gmra.mxu1 %vm429_vm4, %v705_v55  ;;  %v447_v57 = vsel %vm429_vm4, %v705_v55, 0.0  ;;  %v707_v58 = vpop.eup %706 }
 0x2d2   :  { %448 = vadd.xlane.f32.xlu1 %v447_v57  ;;  %v446_v60 = vmul.f32 %v707_v58, %v445_v59 }
 0x2e3   :  { %456 = vperm.xlu1 %691, %v707_v58  }
 0x35b   :  { %v449_v61 = vpop.xlane.xlu1 %448 }
 0x35c   :  { %v450_v62 = vadd.f32 %v449_v61, %v446_v60 }
 0x35e   :  { %452 = vst.msk [vmem:[#allocation4] sm:$0xff] %vm117_vm3, %v450_v62 }
 0x35f   :  { %v457_v3 = vpop.permute.xlu1 %456 }
 0x360   :  { %v459_v4 = vmul.f32 0.0, %v457_v3 }
 0x365   :  { %v540_v63 = vld [vmem:[#allocation4] sm:$0xff] }
 0x366   :  { %708 = vrcp.f32 %v540_v63 }
 0x373   :  { %v709_v0 = vpop.eup %708 }
 0x374   :  { %544 = vperm.xlu1 %691, %v709_v0  }
 0x391   :  { %v529_v1 = vpop.f32.mrf.mxu1 }
 0x392   :  { %v533_v5 = vadd.f32 %v529_v1, %v459_v4 }
 0x393   :  { %v684_v2 = vpop.f32.mrf.mxu1 }
 0x3ef   :  { %v545_v6 = vpop.permute.xlu1 %544 }
 0x3f0   :  { %v547_v7 = vmul.f32 %v545_v6, %v533_v5 }
 0x3f2   :  { %v598_v8 = vmul.f32 -1.442695, %v547_v7 }
 0x3f4   :  { %710 = vpow2.f32 %v598_v8 }
 0x401   :  { %v711_v9 = vpop.eup %710 }
 0x402   :  { %v551_v10 = vadd.f32 1.0, %v711_v9 }
 0x404   :  { %712 = vrcp.f32 %v551_v10 }
 0x411   :  { %v713_v11 = vpop.eup %712 }
 0x412   :  { %554 = vst [vmem:[#allocation6] sm:$0xff] %v713_v11 }
 0x413   :  { %725 = shalt.err (!%p722_p4)
}
 0x414   :  { %564 = dma.vmem_to_hbm [thread:$0]  %s562_s30, 128, %s912_s5, [#allocation7]  }
 0x415   :  { %734 = dma.done.wait [#allocation7], 128  }
 0x416   :  { %735 = vsyncadd [#allocation7], 4294967168 }
 0x417   :  { %568 = vsyncpa [#allocation7], 1 }

</bundles_post_ra>
